<compile_context>
chip_gen: v5e
topology: v5e:2x2
jax: 0.10.0
libtpu: 0.0.40
codegen_flags: <defaults>
</compile_context>

<pallas_src>
import functools

import jax
import jax.numpy as jnp
from jax.experimental import pallas as pl
from jax.experimental.pallas import tpu as pltpu

LANE = 128          # lane width: hidden / output feature dims padded to this
SUBLANE_BF16 = 16   # bf16 sublane pack: batch tile + layer-1 input dim padded to this
TB_MAX = 1024       # batch-tile cap (amortizes per-grid-step overhead)
MIN_SPLIT_B = 256   # split into >=2 grid steps (v7x 2-TC sharding) once B >= this


def _round_up(n: int, m: int) -> int:
    return ((n + m - 1) // m) * m


# ---------------------------------------------------------------------------
# Kernel: one batch tile of the full 4-layer MLP. Weights/biases are VMEM
# resident across all grid steps (constant index_map).
# ---------------------------------------------------------------------------
def mlp_kernel(x_ref, w1_ref, b1_ref, w2_ref, b2_ref,
               w3_ref, b3_ref, w4_ref, b4_ref, o_ref):
    def layer(h_bf16, w_ref, b_ref, relu):
        # bf16 operands on the MXU, f32 accumulation.
        acc = jnp.dot(h_bf16, w_ref[...], preferred_element_type=jnp.float32)
        acc = acc + b_ref[...]            # f32 bias add (broadcast over rows)
        if relu:
            acc = jnp.maximum(acc, 0.0)   # f32 ReLU (v5e has no bf16 VPU path)
        return acc

    h = layer(x_ref[...], w1_ref, b1_ref, relu=True).astype(jnp.bfloat16)
    h = layer(h, w2_ref, b2_ref, relu=True).astype(jnp.bfloat16)
    h = layer(h, w3_ref, b3_ref, relu=True).astype(jnp.bfloat16)
    o_ref[...] = layer(h, w4_ref, b4_ref, relu=False).astype(o_ref.dtype)


# ---------------------------------------------------------------------------
# One-time parameter prep (NOT in the per-call hot path):
#   PyTorch (out, in) -> (in, out); layer-1 input dim padded only to 16
#   (bf16 sublane pack), all output dims (and hence layer 2-4 input dims)
#   padded to 128; weights cast to bf16, biases kept f32 shaped (1, out_pad).
# ---------------------------------------------------------------------------
def prepare_params(params):
    prepped = {}
    for i in range(1, 5):
        w = params[f"w{i}"]               # (out_features, in_features)
        b = params[f"b{i}"]               # (out_features,)
        out_d, in_d = w.shape
        in_p = _round_up(in_d, SUBLANE_BF16 if i == 1 else LANE)
        out_p = _round_up(out_d, LANE)
        w_t = jnp.zeros((in_p, out_p), jnp.float32).at[:in_d, :out_d].set(w.T)
        b_p = jnp.zeros((1, out_p), jnp.float32).at[:, :out_d].set(b)
        prepped[f"w{i}"] = w_t.astype(jnp.bfloat16)
        prepped[f"b{i}"] = b_p
    return prepped


# ---------------------------------------------------------------------------
# Jitted forward: pad x only along batch (and feature dim to a multiple of 16
# if needed), run the batch-tiled pallas_call, slice back to (B, num_classes).
# ---------------------------------------------------------------------------
@functools.partial(jax.jit, static_argnames=("num_classes",))
def simple_net_forward(x, prepped, num_classes):
    B, in_dim = x.shape
    in_pad = prepped["w1"].shape[0]     # layer-1 K (multiple of 16, NOT 128)
    out_pad = prepped["w4"].shape[1]    # lane-dense output width

    # Balanced batch tiling: enough steps to respect TB_MAX, at least 2 steps
    # for large batches (so "parallel" uses both TensorCores on v7x), and the
    # per-step tile rounded to the bf16 sublane pack to minimize dead rows.
    n_steps = -(-B // TB_MAX)
    if n_steps < 2 and B >= MIN_SPLIT_B:
        n_steps = 2
    TB = _round_up(-(-B // n_steps), SUBLANE_BF16)
    B_pad = _round_up(B, TB)

    if B_pad == B and in_pad == in_dim:
        x_p = x.astype(jnp.bfloat16)                      # no pad op needed
    else:
        x_p = (jnp.zeros((B_pad, in_pad), jnp.bfloat16)
               .at[:B, :in_dim].set(x.astype(jnp.bfloat16)))

    const = lambda shape: pl.BlockSpec(shape, lambda i: (0,) * len(shape))

    out_p = pl.pallas_call(
        mlp_kernel,
        out_shape=jax.ShapeDtypeStruct((B_pad, out_pad), jnp.float32),
        grid=(B_pad // TB,),
        in_specs=[
            # x: tiled over batch; last dim is the FULL array extent (legal
            # even though it is not a multiple of 128).
            pl.BlockSpec((TB, in_pad), lambda i: (i, 0)),
            const(prepped["w1"].shape), const(prepped["b1"].shape),
            const(prepped["w2"].shape), const(prepped["b2"].shape),
            const(prepped["w3"].shape), const(prepped["b3"].shape),
            const(prepped["w4"].shape), const(prepped["b4"].shape),
        ],
        out_specs=pl.BlockSpec((TB, out_pad), lambda i: (i, 0)),
        compiler_params=pltpu.CompilerParams(
            dimension_semantics=("parallel",)),   # shard batch steps over TCs
    )(x_p, prepped["w1"], prepped["b1"], prepped["w2"], prepped["b2"],
      prepped["w3"], prepped["b3"], prepped["w4"], prepped["b4"])

    # Slice back to the logical shape (callers that can consume the padded
    # slab may skip this to avoid one extra HBM round-trip).
    return out_p[:B, :num_classes]


# ---------------------------------------------------------------------------
# Init mimicking nn.Linear default (uniform +/- 1/sqrt(fan_in)), PyTorch layout.
# ---------------------------------------------------------------------------
def init_params(key, input_dim, layer1_dim, layer2_dim, layer3_dim, num_classes):
    dims = [(layer1_dim, input_dim), (layer2_dim, layer1_dim),
            (layer3_dim, layer2_dim), (num_classes, layer3_dim)]
    params = {}
    keys = jax.random.split(key, 2 * len(dims))
    for i, (fan_out, fan_in) in enumerate(dims):
        bound = 1.0 / jnp.sqrt(jnp.float32(fan_in))
        params[f"w{i+1}"] = jax.random.uniform(
            keys[2 * i], (fan_out, fan_in), jnp.float32, -bound, bound)
        params[f"b{i+1}"] = jax.random.uniform(
            keys[2 * i + 1], (fan_out,), jnp.float32, -bound, bound)
    return params


def reference_forward(x, params):
    h = x
    for i in range(1, 4):
        h = jnp.maximum(h @ params[f"w{i}"].T + params[f"b{i}"], 0.0)
    return h @ params["w4"].T + params["b4"]


if __name__ == "__main__":
    key = jax.random.PRNGKey(0)
    k_x, k_p = jax.random.split(key)

    batch = 8
    input_dim, layer1_dim, layer2_dim, layer3_dim, num_classes = 32, 64, 64, 32, 16

    x = jax.random.normal(k_x, (batch, input_dim), jnp.float32)
    params = init_params(k_p, input_dim, layer1_dim, layer2_dim, layer3_dim,
                         num_classes)

    prepped = prepare_params(params)          # one-time, outside the hot path
    out = simple_net_forward(x, prepped, num_classes)
    out = jax.block_until_ready(out)

    ref = reference_forward(x, params)        # f32 reference (PyTorch semantics)
    assert out.shape == (batch, num_classes)
    # bf16 MXU operands with f32 accumulation -> bf16-level agreement vs f32 ref.
    assert jnp.allclose(out, ref, atol=5e-2, rtol=5e-2), "mismatch vs reference"

    print("KERNEL_OK")
</pallas_src>

<mosaic_0001>
module attributes {stable_mosaic.version = 11 : i64} {
  func.func @mlp_kernel(%arg0: i32, %arg1: memref<16x32xbf16, #tpu.memory_space<vmem>>, %arg2: memref<32x128xbf16, #tpu.memory_space<vmem>>, %arg3: memref<1x128xf32, #tpu.memory_space<vmem>>, %arg4: memref<128x128xbf16, #tpu.memory_space<vmem>>, %arg5: memref<1x128xf32, #tpu.memory_space<vmem>>, %arg6: memref<128x128xbf16, #tpu.memory_space<vmem>>, %arg7: memref<1x128xf32, #tpu.memory_space<vmem>>, %arg8: memref<128x128xbf16, #tpu.memory_space<vmem>>, %arg9: memref<1x128xf32, #tpu.memory_space<vmem>>, %arg10: memref<16x128xf32, #tpu.memory_space<vmem>>) attributes {dimension_semantics = [#tpu.dimension_semantics<parallel>], iteration_bounds = array<i64: 1>, scalar_prefetch = 0 : i64, scratch_operands = 0 : i64, tpu.core_type = #tpu.core_type<tc>, window_params = [{transform_indices = @transform_0, window_bounds = array<i64: 16, 32>}, {pipeline_mode = #tpu.pipeline_mode<synchronous>, transform_indices = @transform_1, window_bounds = array<i64: 32, 128>}, {pipeline_mode = #tpu.pipeline_mode<synchronous>, transform_indices = @transform_2, window_bounds = array<i64: 1, 128>}, {pipeline_mode = #tpu.pipeline_mode<synchronous>, transform_indices = @transform_3, window_bounds = array<i64: 128, 128>}, {pipeline_mode = #tpu.pipeline_mode<synchronous>, transform_indices = @transform_4, window_bounds = array<i64: 1, 128>}, {pipeline_mode = #tpu.pipeline_mode<synchronous>, transform_indices = @transform_5, window_bounds = array<i64: 128, 128>}, {pipeline_mode = #tpu.pipeline_mode<synchronous>, transform_indices = @transform_6, window_bounds = array<i64: 1, 128>}, {pipeline_mode = #tpu.pipeline_mode<synchronous>, transform_indices = @transform_7, window_bounds = array<i64: 128, 128>}, {pipeline_mode = #tpu.pipeline_mode<synchronous>, transform_indices = @transform_8, window_bounds = array<i64: 1, 128>}, {transform_indices = @transform_9, window_bounds = array<i64: 16, 128>}]} {
    %c0 = arith.constant 0 : index
    %c0_0 = arith.constant 0 : index
    %0 = vector.load %arg1[%c0, %c0_0] : memref<16x32xbf16, #tpu.memory_space<vmem>>, vector<16x32xbf16>
    %c0_1 = arith.constant 0 : index
    %c0_2 = arith.constant 0 : index
    %1 = vector.load %arg2[%c0_1, %c0_2] : memref<32x128xbf16, #tpu.memory_space<vmem>>, vector<32x128xbf16>
    %cst = arith.constant dense<0.000000e+00> : vector<16x128xf32>
    %2 = tpu.matmul %0, %1, %cst {dimension_numbers = #tpu.dot_dimension_numbers<[1], [0], [0], [1], [0, 0, 1, 1], [], []>} : vector<16x32xbf16>, vector<32x128xbf16>, vector<16x128xf32> -> vector<16x128xf32>
    %c0_3 = arith.constant 0 : index
    %c0_4 = arith.constant 0 : index
    %3 = vector.load %arg3[%c0_3, %c0_4] : memref<1x128xf32, #tpu.memory_space<vmem>>, vector<1x128xf32>
    %4 = vector.broadcast %3 : vector<1x128xf32> to vector<16x128xf32>
    %5 = arith.addf %2, %4 : vector<16x128xf32>
    %cst_5 = arith.constant 0.000000e+00 : f32
    %6 = vector.broadcast %cst_5 : f32 to vector<16x128xf32>
    %7 = arith.maximumf %5, %6 : vector<16x128xf32>
    %8 = arith.truncf %7 : vector<16x128xf32> to vector<16x128xbf16>
    %c0_6 = arith.constant 0 : index
    %c0_7 = arith.constant 0 : index
    %9 = vector.load %arg4[%c0_6, %c0_7] : memref<128x128xbf16, #tpu.memory_space<vmem>>, vector<128x128xbf16>
    %cst_8 = arith.constant dense<0.000000e+00> : vector<16x128xf32>
    %10 = tpu.matmul %8, %9, %cst_8 {dimension_numbers = #tpu.dot_dimension_numbers<[1], [0], [0], [1], [0, 0, 1, 1], [], []>} : vector<16x128xbf16>, vector<128x128xbf16>, vector<16x128xf32> -> vector<16x128xf32>
    %c0_9 = arith.constant 0 : index
    %c0_10 = arith.constant 0 : index
    %11 = vector.load %arg5[%c0_9, %c0_10] : memref<1x128xf32, #tpu.memory_space<vmem>>, vector<1x128xf32>
    %12 = vector.broadcast %11 : vector<1x128xf32> to vector<16x128xf32>
    %13 = arith.addf %10, %12 : vector<16x128xf32>
    %cst_11 = arith.constant 0.000000e+00 : f32
    %14 = vector.broadcast %cst_11 : f32 to vector<16x128xf32>
    %15 = arith.maximumf %13, %14 : vector<16x128xf32>
    %16 = arith.truncf %15 : vector<16x128xf32> to vector<16x128xbf16>
    %c0_12 = arith.constant 0 : index
    %c0_13 = arith.constant 0 : index
    %17 = vector.load %arg6[%c0_12, %c0_13] : memref<128x128xbf16, #tpu.memory_space<vmem>>, vector<128x128xbf16>
    %cst_14 = arith.constant dense<0.000000e+00> : vector<16x128xf32>
    %18 = tpu.matmul %16, %17, %cst_14 {dimension_numbers = #tpu.dot_dimension_numbers<[1], [0], [0], [1], [0, 0, 1, 1], [], []>} : vector<16x128xbf16>, vector<128x128xbf16>, vector<16x128xf32> -> vector<16x128xf32>
    %c0_15 = arith.constant 0 : index
    %c0_16 = arith.constant 0 : index
    %19 = vector.load %arg7[%c0_15, %c0_16] : memref<1x128xf32, #tpu.memory_space<vmem>>, vector<1x128xf32>
    %20 = vector.broadcast %19 : vector<1x128xf32> to vector<16x128xf32>
    %21 = arith.addf %18, %20 : vector<16x128xf32>
    %cst_17 = arith.constant 0.000000e+00 : f32
    %22 = vector.broadcast %cst_17 : f32 to vector<16x128xf32>
    %23 = arith.maximumf %21, %22 : vector<16x128xf32>
    %24 = arith.truncf %23 : vector<16x128xf32> to vector<16x128xbf16>
    %c0_18 = arith.constant 0 : index
    %c0_19 = arith.constant 0 : index
    %25 = vector.load %arg8[%c0_18, %c0_19] : memref<128x128xbf16, #tpu.memory_space<vmem>>, vector<128x128xbf16>
    %cst_20 = arith.constant dense<0.000000e+00> : vector<16x128xf32>
    %26 = tpu.matmul %24, %25, %cst_20 {dimension_numbers = #tpu.dot_dimension_numbers<[1], [0], [0], [1], [0, 0, 1, 1], [], []>} : vector<16x128xbf16>, vector<128x128xbf16>, vector<16x128xf32> -> vector<16x128xf32>
    %c0_21 = arith.constant 0 : index
    %c0_22 = arith.constant 0 : index
    %27 = vector.load %arg9[%c0_21, %c0_22] : memref<1x128xf32, #tpu.memory_space<vmem>>, vector<1x128xf32>
    %28 = vector.broadcast %27 : vector<1x128xf32> to vector<16x128xf32>
    %29 = arith.addf %26, %28 : vector<16x128xf32>
    %c0_23 = arith.constant 0 : index
    %c0_24 = arith.constant 0 : index
    %30 = vector.load %arg10[%c0_23, %c0_24] : memref<16x128xf32, #tpu.memory_space<vmem>>, vector<16x128xf32>
    tpu.vector_store %arg10[%c0_23, %c0_24], %29 {strides = array<i32>} : memref<16x128xf32, #tpu.memory_space<vmem>>, vector<16x128xf32>,
    return
  }
  func.func @transform_0(%arg0: i32) -> (i32, i32) {
    %c0_i32 = arith.constant 0 : i32
    %c0_i32_0 = arith.constant 0 : i32
    return %arg0, %c0_i32 : i32, i32
  }
  func.func @transform_1(%arg0: i32) -> (i32, i32) {
    %c0_i32 = arith.constant 0 : i32
    %c0_i32_0 = arith.constant 0 : i32
    %c0_i32_1 = arith.constant 0 : i32
    return %c0_i32, %c0_i32_0 : i32, i32
  }
  func.func @transform_2(%arg0: i32) -> (i32, i32) {
    %c0_i32 = arith.constant 0 : i32
    %c0_i32_0 = arith.constant 0 : i32
    %c0_i32_1 = arith.constant 0 : i32
    return %c0_i32, %c0_i32_0 : i32, i32
  }
  func.func @transform_3(%arg0: i32) -> (i32, i32) {
    %c0_i32 = arith.constant 0 : i32
    %c0_i32_0 = arith.constant 0 : i32
    %c0_i32_1 = arith.constant 0 : i32
    return %c0_i32, %c0_i32_0 : i32, i32
  }
  func.func @transform_4(%arg0: i32) -> (i32, i32) {
    %c0_i32 = arith.constant 0 : i32
    %c0_i32_0 = arith.constant 0 : i32
    %c0_i32_1 = arith.constant 0 : i32
    return %c0_i32, %c0_i32_0 : i32, i32
  }
  func.func @transform_5(%arg0: i32) -> (i32, i32) {
    %c0_i32 = arith.constant 0 : i32
    %c0_i32_0 = arith.constant 0 : i32
    %c0_i32_1 = arith.constant 0 : i32
    return %c0_i32, %c0_i32_0 : i32, i32
  }
  func.func @transform_6(%arg0: i32) -> (i32, i32) {
    %c0_i32 = arith.constant 0 : i32
    %c0_i32_0 = arith.constant 0 : i32
    %c0_i32_1 = arith.constant 0 : i32
    return %c0_i32, %c0_i32_0 : i32, i32
  }
  func.func @transform_7(%arg0: i32) -> (i32, i32) {
    %c0_i32 = arith.constant 0 : i32
    %c0_i32_0 = arith.constant 0 : i32
    %c0_i32_1 = arith.constant 0 : i32
    return %c0_i32, %c0_i32_0 : i32, i32
  }
  func.func @transform_8(%arg0: i32) -> (i32, i32) {
    %c0_i32 = arith.constant 0 : i32
    %c0_i32_0 = arith.constant 0 : i32
    %c0_i32_1 = arith.constant 0 : i32
    return %c0_i32, %c0_i32_0 : i32, i32
  }
  func.func @transform_9(%arg0: i32) -> (i32, i32) {
    %c0_i32 = arith.constant 0 : i32
    %c0_i32_0 = arith.constant 0 : i32
    return %arg0, %c0_i32 : i32, i32
  }
}

</mosaic_0001>

<bundles_post_ra>
// kernel: simple_net_forward.1
= control target key start
LH: loop header
LB: loop body
LE: loop exit
PB: predicated region body
PF: predicated region fallthrough
CT: control target
= control target key end

     0   :  { %14 = vsyncpa [#allocation3], 0  ;;  %s700_s0 = inlined_call_operand.vmem [shape: bf16[16,32], index: 0, kind: input, shape index: {}]   ;;  %s701_s1 = inlined_call_operand.vmem [shape: bf16[32,128], index: 1, kind: input, shape index: {}]   ;;  %s702_s2 = inlined_call_operand.vmem [shape: f32[1,128], index: 2, kind: input, shape index: {}]   ;;  %s703_s3 = inlined_call_operand.hbm [shape: bf16[128,128], index: 3, kind: input, shape index: {}]   ;;  %s704_s4 = inlined_call_operand.vmem [shape: f32[1,128], index: 4, kind: input, shape index: {}]   ;;  %s705_s5 = inlined_call_operand.hbm [shape: bf16[128,128], index: 5, kind: input, shape index: {}]   ;;  %s706_s6 = inlined_call_operand.vmem [shape: f32[1,128], index: 6, kind: input, shape index: {}]   ;;  %s707_s7 = inlined_call_operand.hbm [shape: bf16[128,128], index: 7, kind: input, shape index: {}]   ;;  %s708_s8 = inlined_call_operand.vmem [shape: f32[1,128], index: 8, kind: input, shape index: {}]   ;;  %s709_s9 = inlined_call_operand.vmem [shape: f32[16,128], index: 9, kind: output, shape index: {}]  }
   0x1   :  { %15 = vsyncpa [#allocation5], 0  ;;  %s41_s11 = sshll.u32 %s705_s5, 4  ;;  %s609_s12 = smov [#allocation4]   ;;  %s42_s11 = int_to_ptr.hbm [resolvable:$true] %s41_s11 }
   0x2   :  { %s43_s13 = sshll.u32 %s609_s12, 4  ;;  %s26_s16 = sshll.u32 %s703_s3, 4  ;;  %s44_s13 = int_to_ptr.vmem [resolvable:$true] %s43_s13  ;;  %s27_s16 = int_to_ptr.hbm [resolvable:$true] %s26_s16 }
   0x3   :  { %s610_s17 = smov 64   ;;  %s611_s18 = smov 4  }
   0x4   :  { %49 = dma.hbm_to_vmem [thread:$0]  %s42_s11, 1024, %s44_s13, [#allocation5], %s610_s17, %s610_s17, %s611_s18  }
   0x5   :  { %s612_s19 = smov [#allocation2]   ;;  %s56_s23 = sshll.u32 %s707_s7, 4  ;;  %s57_s23 = int_to_ptr.hbm [resolvable:$true] %s56_s23 }
   0x6   :  { %s28_s20 = sshll.u32 %s612_s19, 4  ;;  %s613_s5 = smov [#allocation6]   ;;  %s29_s20 = int_to_ptr.vmem [resolvable:$true] %s28_s20 }
   0x7   :  { %34 = dma.hbm_to_vmem [thread:$0]  %s27_s16, 1024, %s29_s20, [#allocation3], %s610_s17, %s610_s17, %s611_s18  }
   0x8   :  { %s58_s24 = sshll.u32 %s613_s5, 4  ;;  %s59_s24 = int_to_ptr.vmem [resolvable:$true] %s58_s24 }
   0x9   :  { %64 = dma.hbm_to_vmem [thread:$0]  %s57_s23, 1024, %s59_s24, [#allocation5], %s610_s17, %s610_s17, %s611_s18  }
   0xa   :  { %605 = dma.done.wait [#allocation3], 1024  }
   0xb   :  { %606 = vsyncadd [#allocation3], 4294966272 }
   0xc   :  { %607 = dma.done.wait [#allocation5], 2048  }
   0xd   :  { %608 = vsyncadd [#allocation5], 4294965248  ;;  %v499_v0 = vld [vmem:[%s701_s1 + $0x8] sm:$0xff]  ;;  %v507_v1 = vld [vmem:[#allocation2 + $0x38] sm:$0xff]  ;;  %vm107_vm0 = vcmask 261120  }
   0xe   :  { %117 = vmatpush.bf16.msra.mxu0 %v499_v0  ;;  %v498_v2 = vld [vmem:[%s701_s1] sm:$0xff]  ;;  %v506_v3 = vld [vmem:[#allocation2 + $0x30] sm:$0xff]  ;;  %196 = vmatpush.bf16.msra.mxu1 %v507_v1  ;;  %v505_v5 = vld [vmem:[#allocation2 + $0x28] sm:$0xff] }
   0xf   :  { %v497_v4 = vld [vmem:[%s700_s0] sm:$0xff]  ;;  %v503_v7 = vld [vmem:[#allocation2 + $0x18] sm:$0xff]  ;;  %v502_v8 = vld [vmem:[#allocation2 + $0x10] sm:$0xff] }
  0x10   :  { %v504_v6 = vld [vmem:[#allocation2 + $0x20] sm:$0xff]  ;;  %v501_v9 = vld [vmem:[#allocation2 + $0x8] sm:$0xff]  ;;  %v515_v11 = vld [vmem:[#allocation4 + $0x38] sm:$0xff] }
  0x11   :  { %v500_v10 = vld [vmem:[#allocation2] sm:$0xff]  ;;  %281 = vmatpush.bf16.msra.mxu2 %v515_v11  ;;  %v514_v12 = vld [vmem:[#allocation4 + $0x30] sm:$0xff]  ;;  %v513_v13 = vld [vmem:[#allocation4 + $0x28] sm:$0xff] }
  0x12   :  { %118 = vmatpush.bf16.msra.mxu0 %v498_v2  ;;  %197 = vmatpush.bf16.msra.mxu1 %v506_v3  ;;  %v512_v14 = vld [vmem:[#allocation4 + $0x20] sm:$0xff]  ;;  %v511_v23 = vld [vmem:[#allocation4 + $0x18] sm:$0xff]  ;;  %v510_v24 = vld [vmem:[#allocation4 + $0x10] sm:$0xff] }
  0x13   :  { %v529_v16 = vld [vmem:[%s702_s2] ss:$0 sm:$0xff]  ;;  %v509_v25 = vld [vmem:[#allocation4 + $0x8] sm:$0xff]  ;;  %v523_v27 = vld [vmem:[#allocation6 + $0x38] sm:$0xff] }
  0x14   :  { %v508_v26 = vld [vmem:[#allocation4] sm:$0xff]  ;;  %366 = vmatpush.bf16.msra.mxu3 %v523_v27  ;;  %v522_v28 = vld [vmem:[#allocation6 + $0x30] sm:$0xff]  ;;  %v521_v29 = vld [vmem:[#allocation6 + $0x28] sm:$0xff] }
  0x15   :  { %400 = vmatmul.msk.bf16.vlgmr.msra.gmra.mxu0 %vm107_vm0, %v497_v4  ;;  %282 = vmatpush.bf16.msra.mxu2 %v514_v12  ;;  %v520_v30 = vld [vmem:[#allocation6 + $0x20] sm:$0xff]  ;;  %v519_v39 = vld [vmem:[#allocation6 + $0x18] sm:$0xff]  ;;  %v518_v40 = vld [vmem:[#allocation6 + $0x10] sm:$0xff] }
  0x16   :  { %198 = vmatpush.bf16.msra.mxu1 %v505_v5  ;;  %v530_v32 = vld [vmem:[%s704_s4] ss:$0 sm:$0xff]  ;;  %v517_v41 = vld [vmem:[#allocation6 + $0x8] sm:$0xff] }
  0x17   :  { %v516_v42 = vld [vmem:[#allocation6] sm:$0xff] }
  0x18   :  { %367 = vmatpush.bf16.msra.mxu3 %v522_v28  ;;  %v531_v44 = vld [vmem:[%s706_s6] ss:$0 sm:$0xff] }
  0x19   :  { %283 = vmatpush.bf16.msra.mxu2 %v513_v13  ;;  %v532_v51 = vld [vmem:[%s708_s8] ss:$0 sm:$0xff] }
  0x1a   :  { %199 = vmatpush.bf16.msra.mxu1 %v504_v6 }
  0x1c   :  { %368 = vmatpush.bf16.msra.mxu3 %v521_v29 }
  0x1d   :  { %284 = vmatpush.bf16.msra.mxu2 %v512_v14 }
  0x1e   :  { %200 = vmatpush.bf16.msra.mxu1 %v503_v7 }
  0x20   :  { %369 = vmatpush.bf16.msra.mxu3 %v520_v30 }
  0x21   :  { %285 = vmatpush.bf16.msra.mxu2 %v511_v23 }
  0x22   :  { %201 = vmatpush.bf16.msra.mxu1 %v502_v8 }
  0x24   :  { %370 = vmatpush.bf16.msra.mxu3 %v519_v39 }
  0x25   :  { %286 = vmatpush.bf16.msra.mxu2 %v510_v24 }
  0x26   :  { %202 = vmatpush.bf16.msra.mxu1 %v501_v9 }
  0x28   :  { %371 = vmatpush.bf16.msra.mxu3 %v518_v40 }
  0x29   :  { %287 = vmatpush.bf16.msra.mxu2 %v509_v25 }
  0x2a   :  { %203 = vmatpush.bf16.msra.mxu1 %v500_v10 }
  0x2c   :  { %372 = vmatpush.bf16.msra.mxu3 %v517_v41 }
  0x2d   :  { %288 = vmatpush.bf16.msra.mxu2 %v508_v26 }
  0x30   :  { %373 = vmatpush.bf16.msra.mxu3 %v516_v42 }
  0x92   :  { %v120_v15 = vpop.f32.mrf.mxu0 }
  0x93   :  { %v121_v17 = vadd.f32 %v529_v16, %v120_v15 }
  0x95   :  { %v125_v20 = vmax.f32 %v121_v17, 0.0 }
  0x9a   :  { %v122_v18 = vpop.f32.mrf.mxu0 }
  0x9b   :  { %v123_v19 = vadd.f32 %v529_v16, %v122_v18 }
  0x9d   :  { %v126_v21 = vmax.f32 %v123_v19, 0.0 }
  0x9f   :  { %v127_v22 = vpack.c.bf16 %v126_v21, %v125_v20 }
  0xa1   :  { %204 = vmatmul.bf16.vlgmr.msra.gmra.mxu1 %v127_v22 }
 0x11e   :  { %v205_v31 = vpop.f32.mrf.mxu1 }
 0x11f   :  { %v206_v33 = vadd.f32 %v530_v32, %v205_v31 }
 0x121   :  { %v210_v36 = vmax.f32 %v206_v33, 0.0 }
 0x126   :  { %v207_v34 = vpop.f32.mrf.mxu1 }
 0x127   :  { %v208_v35 = vadd.f32 %v530_v32, %v207_v34 }
 0x129   :  { %v211_v37 = vmax.f32 %v208_v35, 0.0 }
 0x12b   :  { %v212_v38 = vpack.c.bf16 %v211_v37, %v210_v36 }
 0x12d   :  { %289 = vmatmul.bf16.vlgmr.msra.gmra.mxu2 %v212_v38 }
 0x1b0   :  { %v290_v43 = vpop.f32.mrf.mxu2 }
 0x1b1   :  { %v291_v45 = vadd.f32 %v531_v44, %v290_v43 }
 0x1b3   :  { %v295_v48 = vmax.f32 %v291_v45, 0.0 }
 0x1b8   :  { %v292_v46 = vpop.f32.mrf.mxu2 }
 0x1b9   :  { %v293_v47 = vadd.f32 %v531_v44, %v292_v46 }
 0x1bb   :  { %v296_v49 = vmax.f32 %v293_v47, 0.0 }
 0x1bd   :  { %v297_v50 = vpack.c.bf16 %v296_v49, %v295_v48 }
 0x1bf   :  { %374 = vmatmul.bf16.vlgmr.msra.gmra.mxu3 %v297_v50 }
 0x242   :  { %v375_v52 = vpop.f32.mrf.mxu3 }
 0x243   :  { %v376_v53 = vadd.f32 %v532_v51, %v375_v52 }
 0x245   :  { %380 = vst [vmem:[%s709_s9] sm:$0xff] %v376_v53 }
 0x24a   :  { %v377_v54 = vpop.f32.mrf.mxu3 }
 0x24b   :  { %v378_v55 = vadd.f32 %v532_v51, %v377_v54 }
 0x24d   :  { %381 = vst [vmem:[%s709_s9 + $0x8] sm:$0xff] %v378_v55 }
 0x24e   :  { %386 = vsyncpa [#allocation3], 1 }
 0x24f   :  { %387 = vsyncpa [#allocation5], 1 }

</bundles_post_ra>
